<compile_context>
chip_gen: v6e
topology: v6e:2x2x1
jax: 0.10.0
libtpu: 0.0.40
codegen_flags: <defaults>
</compile_context>

<pallas_src>
import jax
import jax.numpy as jnp
from jax.experimental import pallas as pl
from jax.experimental.pallas import tpu as pltpu


def _nll_loss_kernel(pred_ref, target_ref, out_ref):
    # pred_ref:   (B, C) float32 log-probabilities, VMEM
    # target_ref: (B, 1) int32 class indices, VMEM
    # out_ref:    (1, 1) float32 scalar, SMEM
    pred = pred_ref[...]
    tgt = target_ref[...]
    B, C = pred.shape

    cls_ids = jax.lax.broadcasted_iota(jnp.int32, (B, C), dimension=1)
    # Select pred[i, target[i]] per row with a single vsel (VPU), then reduce.
    picked = jnp.where(cls_ids == tgt, pred, 0.0)
    # TODO(synk): no ignore_index=-100 handling (PyTorch default); never used here.
    out_ref[0, 0] = -jnp.sum(picked) * (1.0 / B)


def _fused_log_softmax_nll_kernel(logits_ref, target_ref, out_ref):
    # Optional fused variant: takes raw logits, computes log_softmax + NLL in
    # one pass so the (B, C) log-prob tensor never round-trips through HBM.
    logits = logits_ref[...]                       # (B, C) float32
    tgt = target_ref[...]                          # (B, 1) int32
    B, C = logits.shape

    row_max = jnp.max(logits, axis=1, keepdims=True)            # (B, 1)
    shifted = logits - row_max                                   # (B, C)
    logz = jnp.log(jnp.sum(jnp.exp(shifted), axis=1, keepdims=True))  # (B, 1)

    cls_ids = jax.lax.broadcasted_iota(jnp.int32, (B, C), dimension=1)
    picked = jnp.sum(jnp.where(cls_ids == tgt, shifted, 0.0),
                     axis=1, keepdims=True)                      # (B, 1)

    # nll = mean_i( logZ_i - shifted[i, target[i]] )
    out_ref[0, 0] = jnp.sum(logz - picked) * (1.0 / B)


def _scalar_loss_call(kernel, mat, target2d):
    return pl.pallas_call(
        kernel,
        out_shape=jax.ShapeDtypeStruct((1, 1), jnp.float32),
        in_specs=[
            pl.BlockSpec(memory_space=pltpu.MemorySpace.VMEM),  # whole (B, C) tile
            pl.BlockSpec(memory_space=pltpu.MemorySpace.VMEM),  # whole (B, 1) tile
        ],
        out_specs=pl.BlockSpec(memory_space=pltpu.MemorySpace.SMEM),
    )(mat, target2d)[0, 0]


def _prep_target(target, B):
    if target.dtype != jnp.int32:
        target = target.astype(jnp.int32)
    return target.reshape(B, 1)


def nll_loss_pallas(pred, target, trans_feat=None):
    """F.nll_loss(pred, target), mean reduction. trans_feat is ignored (as in the module)."""
    del trans_feat
    B, C = pred.shape
    if pred.dtype != jnp.float32:
        pred = pred.astype(jnp.float32)
    return _scalar_loss_call(_nll_loss_kernel, pred, _prep_target(target, B))


def cross_entropy_from_logits_pallas(logits, target, trans_feat=None):
    """Fused log_softmax + nll_loss (call-site fusion of the classifier head)."""
    del trans_feat
    B, C = logits.shape
    if logits.dtype != jnp.float32:
        logits = logits.astype(jnp.float32)
    return _scalar_loss_call(_fused_log_softmax_nll_kernel, logits, _prep_target(target, B))


# module-faithful entry point
def get_loss_forward(pred, target, trans_feat):
    return nll_loss_pallas(pred, target, trans_feat)


if __name__ == "__main__":
    key = jax.random.PRNGKey(0)
    k_logits, k_tgt, k_tf = jax.random.split(key, 3)

    B, C = 8, 16  # small shapes: batch=8, num_classes=16
    logits = jax.random.normal(k_logits, (B, C), dtype=jnp.float32)
    pred = jax.nn.log_softmax(logits, axis=-1)            # log-probs, like PointNet++ head
    target = jax.random.randint(k_tgt, (B,), 0, C, dtype=jnp.int32)
    trans_feat = jax.random.normal(k_tf, (B, 4, 4), dtype=jnp.float32)  # unused, as in the module

    # 1) module-faithful NLL kernel (pred = log-probs)
    loss = jax.block_until_ready(get_loss_forward(pred, target, trans_feat))
    ref = -jnp.mean(pred[jnp.arange(B), target])
    assert jnp.allclose(loss, ref, atol=1e-6), (loss, ref)

    # 2) fused log_softmax + NLL kernel (takes raw logits)
    fused = jax.block_until_ready(cross_entropy_from_logits_pallas(logits, target))
    assert jnp.allclose(fused, ref, atol=1e-5, rtol=1e-5), (fused, ref)

    print("KERNEL_OK")
</pallas_src>

<mosaic_0001>
module attributes {stable_mosaic.version = 11 : i64} {
  func.func @_nll_loss_kernel(%arg0: memref<8x16xf32, #tpu.memory_space<vmem>>, %arg1: memref<8x1xi32, #tpu.memory_space<vmem>>, %arg2: memref<1x1xf32, #tpu.memory_space<smem>>) attributes {dimension_semantics = [], scalar_prefetch = 0 : i64, scratch_operands = 0 : i64, tpu.core_type = #tpu.core_type<tc>} {
    %c0 = arith.constant 0 : index
    %c0_0 = arith.constant 0 : index
    %0 = vector.load %arg0[%c0, %c0_0] : memref<8x16xf32, #tpu.memory_space<vmem>>, vector<8x16xf32>
    %c0_1 = arith.constant 0 : index
    %c0_2 = arith.constant 0 : index
    %1 = vector.load %arg1[%c0_1, %c0_2] : memref<8x1xi32, #tpu.memory_space<vmem>>, vector<8x1xi32>
    %2 = tpu.iota {dimensions = array<i32: 1>} : vector<8x16xi32>
    %3 = vector.broadcast %1 : vector<8x1xi32> to vector<8x16xi32>
    %4 = arith.cmpi eq, %2, %3 : vector<8x16xi32>
    %cst = arith.constant 0.000000e+00 : f32
    %5 = vector.broadcast %cst : f32 to vector<8x16xf32>
    %6 = arith.select %4, %0, %5 : vector<8x16xi1>, vector<8x16xf32>
    %7 = vector.shape_cast %6 : vector<8x16xf32> to vector<1x8x16xf32>
    %cst_3 = arith.constant dense<0.000000e+00> : vector<1xf32>
    %8 = vector.multi_reduction <add>, %7, %cst_3 [1, 2] : vector<1x8x16xf32> to vector<1xf32>
    %9 = vector.shape_cast %8 : vector<1xf32> to vector<1x1x1xf32>
    %10 = vector.extract %9[0, 0, 0] : f32 from vector<1x1x1xf32>
    %cst_4 = arith.constant 0.000000e+00 : f32
    %11 = arith.subf %cst_4, %10 : f32
    %cst_5 = arith.constant 1.250000e-01 : f32
    %12 = arith.mulf %11, %cst_5 : f32
    %c0_6 = arith.constant 0 : index
    %c0_7 = arith.constant 0 : index
    %13 = memref.load %arg2[%c0_6, %c0_7] : memref<1x1xf32, #tpu.memory_space<smem>>
    memref.store %12, %arg2[%c0_6, %c0_7] : memref<1x1xf32, #tpu.memory_space<smem>>
    return
  }
}

</mosaic_0001>

<bundles_post_ra>
// kernel: tpu_custom_call.1
= control target key start
LH: loop header
LB: loop body
LE: loop exit
PB: predicated region body
PF: predicated region fallthrough
CT: control target
= control target key end

     0   :  { %s90_s0 = inlined_call_operand.vmem [shape: f32[8,16], index: 0, kind: input, shape index: {}]   ;;  %s91_s1 = inlined_call_operand.vmem [shape: s32[8,1], index: 1, kind: input, shape index: {}]   ;;  %s92_s2 = inlined_call_operand.hbm [shape: f32[1,1], index: 2, kind: output, shape index: {}]  }
   0x1   :  { %v13_v0 = vld [vmem:[%s91_s1] sm:$0xff] }
   0x2   :  { %7 = vsyncpa [#allocation3], 0  ;;  %v64_v1 = vmov 0   ;;  %v14_v2 = vlaneseq  ;;  %v12_v4 = vld [vmem:[%s90_s0] sm:$0xff]  ;;  %vm21_vm0 = vcmask 130048   ;;  %s65_s15 = smov [#allocation2]  }
   0x3   :  { %53 = vset.pattern.permute.xlu0 %v64_v1 }
   0x4   :  { %17 = vperm.xlu0 %53, %v13_v0   ;;  %v15_v3 = vand.u32 127, %v14_v2 }
  0x7f   :  { %v18_v5 = vpop.permute.xlu0 %17 }
  0x80   :  { %vm19_vm1 = vcmp.eq.s32.totalorder %v15_v3, %v18_v5 }
  0x81   :  { %v20_v6 = vsel %vm19_vm1, %v12_v4, 0.0 }
  0x82   :  { %v22_v7 = vsel %vm21_vm0, %v20_v6, 0.0 }
  0x83   :  { %23 = vadd.xlane.f32.xlu0 %v22_v7 }
 0x10c   :  { %v24_v8 = vpop.xlane.xlu0 %23 }
 0x10d   :  { %v25_v9 = vrot.slane %v24_v8, 4 }
 0x10f   :  { %v26_v10 = vadd.f32 %v25_v9, %v24_v8 }
 0x111   :  { %v27_v11 = vrot.slane %v26_v10, 2 }
 0x113   :  { %v28_v12 = vadd.f32 %v27_v11, %v26_v10 }
 0x115   :  { %v29_v13 = vrot.slane %v28_v12, 1 }
 0x117   :  { %v30_v14 = vadd.f32 %v29_v13, %v28_v12 }
 0x119   :  { %49 = vpush %v30_v14 }
 0x14a   :  { %s50_s1 = spop %49 }
 0x14b   :  { %s32_s13 = ssub.f32 0.0, %s50_s1 }
 0x14d   :  { %s33_s14 = smul.f32 0.125, %s32_s13 }
 0x14f   :  { %35 = sst [smem:[#allocation2]] %s33_s14 }
 0x150   :  { %43 = dma.smem_to_hbm %s65_s15, 16, %s92_s2, [#allocation3]  }
 0x151   :  { %62 = dma.done.wait [#allocation3], 16  }
 0x152   :  { %63 = vsyncadd [#allocation3], 4294967280 }
 0x153   :  { %47 = sfence }
 0x154   :  { %48 = vsyncpa [#allocation3], 1 }

</bundles_post_ra>
